<compile_context>
chip_gen: v7x
topology: tpu7x:2x2x1
jax: 0.10.0
libtpu: 0.0.40
codegen_flags: <defaults>
</compile_context>

<pallas_src>
import jax
import jax.numpy as jnp
from jax import lax
from jax.experimental import pallas as pl
from jax.experimental.pallas import tpu as pltpu

_ATOL = 1e-7   # torch.allclose atol used by the module
_RTOL = 1e-5   # torch.allclose default rtol


# ---------------------------------------------------------------------------
# Kernel: one batch tile in (dim, TILE_B) layout (dim on sublanes, batch lanes)
# ---------------------------------------------------------------------------
def _hyperbolic_log_kernel(x_ref, y_ref, o_ref, viol_ref):
    x = x_ref[...].astype(jnp.float32)               # (D, TB)
    y = y_ref[...].astype(jnp.float32)

    # Row 0 (sublane 0) is the Minkowski time coordinate.
    spatial = lax.broadcasted_iota(jnp.int32, x.shape, 0) != 0

    x0 = x[0:1, :]                                    # (1, TB)
    y0 = y[0:1, :]
    xs = jnp.where(spatial, x, 0.0)                   # spatial part (time row = 0)
    ys = jnp.where(spatial, y, 0.0)

    # ---- project_to_hyperboloid(x), project_to_hyperboloid(y) ----------------
    x_sn2 = jnp.sum(xs * xs, axis=0, keepdims=True)   # (1, TB)
    y_sn2 = jnp.sum(ys * ys, axis=0, keepdims=True)
    x_sn = jnp.sqrt(x_sn2)
    y_sn = jnp.sqrt(y_sn2)
    xh0 = jnp.where(x_sn > jnp.abs(x0), 0.9 * x_sn, jnp.sqrt(1.0 + x_sn2))
    yh0 = jnp.where(y_sn > jnp.abs(y0), 0.9 * y_sn, jnp.sqrt(1.0 + y_sn2))
    # spatial parts of the projected points are unchanged (== xs / ys).

    # ---- per-tile torch.allclose(x_proj, y_proj, atol=1e-7) violation --------
    # close  <=>  |a - b| <= atol + rtol * |b|  for every element, i.e. the
    # max "violation" over the tile is <= 0.
    viol_sp = jnp.max(jnp.abs(xs - ys) - (_ATOL + _RTOL * jnp.abs(ys)),
                      axis=0, keepdims=True)                      # (1, TB)
    viol_t = jnp.abs(xh0 - yh0) - (_ATOL + _RTOL * jnp.abs(yh0))  # (1, TB)
    viol = jnp.max(jnp.maximum(viol_sp, viol_t), axis=1, keepdims=True)  # (1, 1)
    viol_ref[...] = jnp.broadcast_to(viol, viol_ref.shape)

    # ---- shared tangent-projection state (hoisted; both calls reuse it) ------
    xh0sq = xh0 * xh0
    x_space = x_sn2 > xh0sq                           # projected x is spacelike
    y_space = y_sn2 > yh0 * yh0                       # projected y is spacelike
    inner_xx = jnp.where(x_space, x_sn2, x_sn2 - xh0sq)   # <xh, xh>
    inv_nx = 1.0 / jnp.sqrt(jnp.abs(inner_xx))        # exact (no approx recip)
    xn0 = xh0 * inv_nx                                # normalized time coord
    xns = xs * inv_nx                                 # normalized spatial, row0 = 0
    inv_xn0 = 1.0 / xn0

    def proj_tangent(v0, vs, v_space):
        """project_to_tangent(xh, v); v given as (time, spatial, spacelike flag)."""
        space_inner = jnp.sum(xns * vs, axis=0, keepdims=True)
        inner_xv = jnp.where(x_space & v_space, space_inner,
                             space_inner - xn0 * v0)
        vps = vs + inner_xv * xns                     # spatial rows of v_proj (row0=0)
        inv_sn = 1.0 / jnp.maximum(
            jnp.sqrt(jnp.sum(vps * vps, axis=0, keepdims=True)), 1e-7)
        v_spatial = vps * inv_sn
        t_val = jnp.sum(xns * v_spatial, axis=0, keepdims=True) * inv_xn0
        return t_val, v_spatial

    # ---- dist = acosh(clamp(-<xh, yh>, 1 + 1e-7, 5)) --------------------------
    xy_space = jnp.sum(xs * ys, axis=0, keepdims=True)
    mink_xy = jnp.where(x_space & y_space, xy_space, xy_space - xh0 * yh0)
    inner = jnp.clip(-mink_xy, 1.0 + 1e-7, 5.0)
    # acosh(z) = log(z + sqrt((z - 1)(z + 1))) - cancellation-safe near z ~ 1.
    dist = jnp.log(inner + jnp.sqrt((inner - 1.0) * (inner + 1.0)))
    # NOTE: the reference's `if torch.all(dist <= 1e-7)` branch is unreachable
    # (dist >= acosh(1 + 1e-7) ~ 4.5e-4 after the clamp) -> dead branch removed.

    # ---- y_tan = project_to_tangent(xh, yh) -----------------------------------
    t1, s1 = proj_tangent(yh0, ys, y_space)
    s1_sn2 = jnp.sum(s1 * s1, axis=0, keepdims=True)
    t1sq = t1 * t1
    ytan_space = s1_sn2 > t1sq
    mink_yt = jnp.where(ytan_space, s1_sn2, s1_sn2 - t1sq)
    y_tan_norm = jnp.maximum(jnp.sqrt(jnp.maximum(mink_yt, 1e-12)), 1e-7)
    scale = jnp.clip(dist / y_tan_norm, -5.0, 5.0)    # strictly > 0

    # ---- out = project_to_tangent(xh, scale * y_tan) --------------------------
    # scale > 0, so (scale * y_tan) has the same spacelike flag as y_tan.
    t2, s2 = proj_tangent(scale * t1, scale * s1, ytan_space)

    o_ref[...] = jnp.where(spatial, s2, t2).astype(o_ref.dtype)


# ---------------------------------------------------------------------------
# Tiling heuristic
# ---------------------------------------------------------------------------
def _round_up(v: int, m: int) -> int:
    return ((v + m - 1) // m) * m


def _pick_tiles(batch: int, d: int) -> tuple[int, int]:
    """Lane-dense batch tile (multiple of 128) + tile count.

    Targets ~512 KiB per f32 operand block (so I/O double-buffers plus the
    kernel's in-VMEM temporaries stay well inside every generation's VMEM),
    and uses >= 2 (preferably even) tiles when there is enough work so the
    "parallel" batch axis can occupy both TensorCores on v7x.
    """
    need = _round_up(max(batch, 1), 128)
    d_pad = _round_up(d, 8)
    cap = max(128, ((512 << 10) // (d_pad * 4)) // 128 * 128)
    tile_b = min(cap, need)
    num_tiles = -(-need // tile_b)
    if num_tiles == 1 and need >= 512:
        num_tiles = 2                      # megacore: give each TC a tile
    elif num_tiles > 1 and num_tiles % 2 == 1:
        num_tiles += 1                     # prefer an even tile count
    tile_b = _round_up(-(-need // num_tiles), 128)
    num_tiles = -(-need // tile_b)
    return tile_b, num_tiles


# ---------------------------------------------------------------------------
# Wrapper
# ---------------------------------------------------------------------------
def hyperbolic_logarithm(x, y):
    """Forward of HyperbolicLogarithm (log map on the hyperboloid), shapes (..., dim)."""
    assert x.shape == y.shape, "x and y must have the same shape"
    orig_shape = x.shape
    out_dtype = x.dtype
    d = orig_shape[-1]
    assert d >= 2, "dim must be >= 2 (time + at least one space coordinate)"

    # Keep the caller's dtype end-to-end; the kernel upcasts to f32 internally.
    xf = x.reshape(-1, d)
    yf = y.reshape(-1, d)
    b = xf.shape[0]

    tile_b, num_tiles = _pick_tiles(b, d)
    b_pad = num_tiles * tile_b

    # (dim, batch) layout: batch on the 128-lane axis, coordinates on sublanes.
    # TODO(synk): these two input relayouts (and the output transpose below)
    # still run as XLA HBM passes; doing the (tile_b, d) <-> (d, tile_b)
    # transpose in-kernel on the idle XLU would cut ~2x end-to-end HBM traffic,
    # but Mosaic transpose support for minor-dim == d blocks is not guaranteed
    # across generations, so the robust wrapper-side relayout is kept.
    xt = jnp.pad(xf, ((0, b_pad - b), (0, 0))).T
    yt = jnp.pad(yf, ((0, b_pad - b), (0, 0))).T

    out_t, viol = pl.pallas_call(
        _hyperbolic_log_kernel,
        out_shape=(
            jax.ShapeDtypeStruct((d, b_pad), out_dtype),
            jax.ShapeDtypeStruct((1, num_tiles * 128), jnp.float32),
        ),
        grid=(num_tiles,),
        in_specs=[
            pl.BlockSpec((d, tile_b), lambda i: (0, i)),
            pl.BlockSpec((d, tile_b), lambda i: (0, i)),
        ],
        out_specs=(
            pl.BlockSpec((d, tile_b), lambda i: (0, i)),
            pl.BlockSpec((1, 128), lambda i: (0, i)),
        ),
        compiler_params=pltpu.CompilerParams(
            dimension_semantics=("parallel",),   # shard batch tiles across TCs (v7x)
            vmem_limit_bytes=32 << 20,
        ),
    )(xt, yt)

    # Global torch.allclose early-return, applied as a scalar select outside the
    # kernel.  Padded columns are zero in both inputs, project to identical
    # points and therefore never flip the flag.
    all_close = jnp.max(viol) <= 0.0
    out = out_t[:, :b].T.reshape(orig_shape)
    return jnp.where(all_close, jnp.zeros((), out.dtype), out)


# ---------------------------------------------------------------------------
# Pure-JAX/XLA reference (mirrors the PyTorch module, batch-major layout)
# ---------------------------------------------------------------------------
def _reference(x, y):
    orig_shape = x.shape
    d = orig_shape[-1]
    xf = jnp.asarray(x, jnp.float32).reshape(-1, d)
    yf = jnp.asarray(y, jnp.float32).reshape(-1, d)

    def mink(a, b):
        t = a[:, 0] * b[:, 0]
        s = jnp.sum(a[:, 1:] * b[:, 1:], axis=-1)
        a_sl = jnp.sum(a[:, 1:] ** 2, axis=-1) > a[:, 0] ** 2
        b_sl = jnp.sum(b[:, 1:] ** 2, axis=-1) > b[:, 0] ** 2
        return jnp.where(a_sl & b_sl, s, s - t)

    def proj_h(a):
        sn = jnp.sqrt(jnp.sum(a[:, 1:] ** 2, axis=-1))
        t = jnp.where(sn > jnp.abs(a[:, 0]), 0.9 * sn, jnp.sqrt(1.0 + sn ** 2))
        return jnp.concatenate([t[:, None], a[:, 1:]], axis=-1)

    def proj_t(a, v):
        an = proj_h(a)
        an = an / jnp.sqrt(jnp.abs(mink(an, an)))[:, None]
        iv = mink(an, v)
        vp = v + iv[:, None] * an
        sn = jnp.maximum(
            jnp.sqrt(jnp.sum(vp[:, 1:] ** 2, axis=-1, keepdims=True)), 1e-7)
        vs = vp[:, 1:] / sn
        t = jnp.sum(an[:, 1:] * vs, axis=-1) / an[:, 0]
        return jnp.concatenate([t[:, None], vs], axis=-1)

    xh = proj_h(xf)
    yh = proj_h(yf)
    all_close = jnp.all(jnp.abs(xh - yh) <= (_ATOL + _RTOL * jnp.abs(yh)))
    inner = jnp.clip(-mink(xh, yh), 1.0 + 1e-7, 5.0)
    dist = jnp.arccosh(inner)
    # (the `dist <= 1e-7` branch of the module is unreachable after the clamp)
    y_tan = proj_t(xh, yh)
    y_tan_norm = jnp.maximum(jnp.sqrt(jnp.maximum(mink(y_tan, y_tan), 1e-12)), 1e-7)
    scale = jnp.clip((dist / y_tan_norm)[:, None], -5.0, 5.0)
    out = proj_t(xh, scale * y_tan)
    out = jnp.where(all_close, jnp.zeros_like(out), out)
    return out.reshape(orig_shape)


if __name__ == "__main__":
    key = jax.random.PRNGKey(0)
    kx1, ky1, kx2, ky2 = jax.random.split(key, 4)

    # Small shape consistent with the module: batch dims (2, 8), dim = 8.
    x1 = jax.random.normal(kx1, (2, 8, 8), dtype=jnp.float32)
    y1 = jax.random.normal(ky1, (2, 8, 8), dtype=jnp.float32)
    out1 = jax.block_until_ready(hyperbolic_logarithm(x1, y1))
    ref1 = _reference(x1, y1)
    assert out1.shape == x1.shape and out1.dtype == x1.dtype
    assert jnp.allclose(out1, ref1, atol=1e-4, rtol=1e-4), (
        "Pallas output mismatch vs reference: max abs err = "
        f"{float(jnp.max(jnp.abs(out1 - ref1)))}")

    # Larger batch: exercises the multi-tile grid, padding-free path and the
    # cross-tile allclose-flag reduction.
    x2 = jax.random.normal(kx2, (4, 128, 8), dtype=jnp.float32)
    y2 = jax.random.normal(ky2, (4, 128, 8), dtype=jnp.float32)
    out2 = jax.block_until_ready(hyperbolic_logarithm(x2, y2))
    ref2 = _reference(x2, y2)
    assert jnp.allclose(out2, ref2, atol=1e-4, rtol=1e-4), (
        "Pallas output mismatch vs reference (multi-tile): max abs err = "
        f"{float(jnp.max(jnp.abs(out2 - ref2)))}")

    # Exercise the global allclose early-return path (must return zeros).
    out_same = jax.block_until_ready(hyperbolic_logarithm(x1, x1))
    assert jnp.allclose(out_same, jnp.zeros_like(out_same))

    print("KERNEL_OK")
</pallas_src>

<mosaic_0001>
module attributes {stable_mosaic.version = 11 : i64} {
  func.func @_hyperbolic_log_kernel(%arg0: i32, %arg1: memref<8x128xf32, #tpu.memory_space<vmem>>, %arg2: memref<8x128xf32, #tpu.memory_space<vmem>>, %arg3: memref<8x128xf32, #tpu.memory_space<vmem>>, %arg4: memref<1x128xf32, #tpu.memory_space<vmem>>) attributes {dimension_semantics = [#tpu.dimension_semantics<parallel>], iteration_bounds = array<i64: 1>, scalar_prefetch = 0 : i64, scratch_operands = 0 : i64, tpu.core_type = #tpu.core_type<tc>, window_params = [{transform_indices = @transform_0, window_bounds = array<i64: 8, 128>}, {transform_indices = @transform_1, window_bounds = array<i64: 8, 128>}, {transform_indices = @transform_2, window_bounds = array<i64: 8, 128>}, {transform_indices = @transform_3, window_bounds = array<i64: 1, 128>}]} {
    %c0 = arith.constant 0 : index
    %c0_0 = arith.constant 0 : index
    %0 = vector.load %arg1[%c0, %c0_0] : memref<8x128xf32, #tpu.memory_space<vmem>>, vector<8x128xf32>
    %c0_1 = arith.constant 0 : index
    %c0_2 = arith.constant 0 : index
    %1 = vector.load %arg2[%c0_1, %c0_2] : memref<8x128xf32, #tpu.memory_space<vmem>>, vector<8x128xf32>
    %2 = tpu.iota {dimensions = array<i32: 0>} : vector<8x128xi32>
    %c0_i32 = arith.constant 0 : i32
    %3 = vector.broadcast %c0_i32 : i32 to vector<8x128xi32>
    %4 = arith.cmpi ne, %2, %3 : vector<8x128xi32>
    %5 = vector.extract_strided_slice %0 {offsets = [0, 0], sizes = [1, 128], strides = [1, 1]} : vector<8x128xf32> to vector<1x128xf32>
    %6 = vector.extract_strided_slice %1 {offsets = [0, 0], sizes = [1, 128], strides = [1, 1]} : vector<8x128xf32> to vector<1x128xf32>
    %cst = arith.constant 0.000000e+00 : f32
    %7 = vector.broadcast %cst : f32 to vector<8x128xf32>
    %8 = arith.select %4, %0, %7 : vector<8x128xi1>, vector<8x128xf32>
    %cst_3 = arith.constant 0.000000e+00 : f32
    %9 = vector.broadcast %cst_3 : f32 to vector<8x128xf32>
    %10 = arith.select %4, %1, %9 : vector<8x128xi1>, vector<8x128xf32>
    %11 = arith.mulf %8, %8 : vector<8x128xf32>
    %cst_4 = arith.constant dense<0.000000e+00> : vector<128xf32>
    %12 = vector.multi_reduction <add>, %11, %cst_4 [0] : vector<8x128xf32> to vector<128xf32>
    %13 = vector.shape_cast %12 : vector<128xf32> to vector<1x128xf32>
    %14 = arith.mulf %10, %10 : vector<8x128xf32>
    %cst_5 = arith.constant dense<0.000000e+00> : vector<128xf32>
    %15 = vector.multi_reduction <add>, %14, %cst_5 [0] : vector<8x128xf32> to vector<128xf32>
    %16 = vector.shape_cast %15 : vector<128xf32> to vector<1x128xf32>
    %17 = math.sqrt %13 : vector<1x128xf32>
    %18 = math.sqrt %16 : vector<1x128xf32>
    %19 = math.absf %5 : vector<1x128xf32>
    %20 = arith.cmpf ogt, %17, %19 : vector<1x128xf32>
    %cst_6 = arith.constant 0.899999976 : f32
    %21 = vector.broadcast %cst_6 : f32 to vector<1x128xf32>
    %22 = arith.mulf %21, %17 : vector<1x128xf32>
    %cst_7 = arith.constant 1.000000e+00 : f32
    %23 = vector.broadcast %cst_7 : f32 to vector<1x128xf32>
    %24 = arith.addf %23, %13 : vector<1x128xf32>
    %25 = math.sqrt %24 : vector<1x128xf32>
    %26 = arith.select %20, %22, %25 : vector<1x128xi1>, vector<1x128xf32>
    %27 = math.absf %6 : vector<1x128xf32>
    %28 = arith.cmpf ogt, %18, %27 : vector<1x128xf32>
    %cst_8 = arith.constant 0.899999976 : f32
    %29 = vector.broadcast %cst_8 : f32 to vector<1x128xf32>
    %30 = arith.mulf %29, %18 : vector<1x128xf32>
    %cst_9 = arith.constant 1.000000e+00 : f32
    %31 = vector.broadcast %cst_9 : f32 to vector<1x128xf32>
    %32 = arith.addf %31, %16 : vector<1x128xf32>
    %33 = math.sqrt %32 : vector<1x128xf32>
    %34 = arith.select %28, %30, %33 : vector<1x128xi1>, vector<1x128xf32>
    %35 = arith.subf %8, %10 : vector<8x128xf32>
    %36 = math.absf %35 : vector<8x128xf32>
    %37 = math.absf %10 : vector<8x128xf32>
    %cst_10 = arith.constant 9.99999974E-6 : f32
    %38 = vector.broadcast %cst_10 : f32 to vector<8x128xf32>
    %39 = arith.mulf %38, %37 : vector<8x128xf32>
    %cst_11 = arith.constant 1.000000e-07 : f32
    %40 = vector.broadcast %cst_11 : f32 to vector<8x128xf32>
    %41 = arith.addf %40, %39 : vector<8x128xf32>
    %42 = arith.subf %36, %41 : vector<8x128xf32>
    %cst_12 = arith.constant dense<0xFF800000> : vector<128xf32>
    %43 = vector.multi_reduction <maximumf>, %42, %cst_12 [0] : vector<8x128xf32> to vector<128xf32>
    %44 = vector.shape_cast %43 : vector<128xf32> to vector<1x128xf32>
    %45 = arith.subf %26, %34 : vector<1x128xf32>
    %46 = math.absf %45 : vector<1x128xf32>
    %47 = math.absf %34 : vector<1x128xf32>
    %cst_13 = arith.constant 9.99999974E-6 : f32
    %48 = vector.broadcast %cst_13 : f32 to vector<1x128xf32>
    %49 = arith.mulf %48, %47 : vector<1x128xf32>
    %cst_14 = arith.constant 1.000000e-07 : f32
    %50 = vector.broadcast %cst_14 : f32 to vector<1x128xf32>
    %51 = arith.addf %50, %49 : vector<1x128xf32>
    %52 = arith.subf %46, %51 : vector<1x128xf32>
    %53 = arith.maximumf %44, %52 : vector<1x128xf32>
    %cst_15 = arith.constant dense<0xFF800000> : vector<1xf32>
    %54 = vector.multi_reduction <maximumf>, %53, %cst_15 [1] : vector<1x128xf32> to vector<1xf32>
    %55 = vector.shape_cast %54 : vector<1xf32> to vector<1x1xf32>
    %56 = vector.shape_cast %55 : vector<1x1xf32> to vector<1x1xf32>
    %57 = vector.broadcast %56 : vector<1x1xf32> to vector<1x128xf32>
    %c0_16 = arith.constant 0 : index
    %c0_17 = arith.constant 0 : index
    %58 = vector.load %arg4[%c0_16, %c0_17] : memref<1x128xf32, #tpu.memory_space<vmem>>, vector<1x128xf32>
    tpu.vector_store %arg4[%c0_16, %c0_17], %57 {strides = array<i32>} : memref<1x128xf32, #tpu.memory_space<vmem>>, vector<1x128xf32>,
    %59 = arith.mulf %26, %26 : vector<1x128xf32>
    %60 = arith.cmpf ogt, %13, %59 : vector<1x128xf32>
    %61 = arith.mulf %34, %34 : vector<1x128xf32>
    %62 = arith.cmpf ogt, %16, %61 : vector<1x128xf32>
    %63 = arith.subf %13, %59 : vector<1x128xf32>
    %64 = arith.select %60, %13, %63 : vector<1x128xi1>, vector<1x128xf32>
    %65 = math.absf %64 : vector<1x128xf32>
    %66 = math.sqrt %65 : vector<1x128xf32>
    %cst_18 = arith.constant 1.000000e+00 : f32
    %67 = vector.broadcast %cst_18 : f32 to vector<1x128xf32>
    %68 = arith.divf %67, %66 : vector<1x128xf32>
    %69 = arith.mulf %26, %68 : vector<1x128xf32>
    %70 = vector.broadcast %68 : vector<1x128xf32> to vector<8x128xf32>
    %71 = arith.mulf %8, %70 : vector<8x128xf32>
    %cst_19 = arith.constant 1.000000e+00 : f32
    %72 = vector.broadcast %cst_19 : f32 to vector<1x128xf32>
    %73 = arith.divf %72, %69 : vector<1x128xf32>
    %74 = arith.mulf %8, %10 : vector<8x128xf32>
    %cst_20 = arith.constant dense<0.000000e+00> : vector<128xf32>
    %75 = vector.multi_reduction <add>, %74, %cst_20 [0] : vector<8x128xf32> to vector<128xf32>
    %76 = vector.shape_cast %75 : vector<128xf32> to vector<1x128xf32>
    %77 = arith.andi %60, %62 : vector<1x128xi1>
    %78 = arith.mulf %26, %34 : vector<1x128xf32>
    %79 = arith.subf %76, %78 : vector<1x128xf32>
    %80 = arith.select %77, %76, %79 : vector<1x128xi1>, vector<1x128xf32>
    %cst_21 = arith.constant 0.000000e+00 : f32
    %81 = vector.broadcast %cst_21 : f32 to vector<1x128xf32>
    %82 = arith.subf %81, %80 : vector<1x128xf32>
    %cst_22 = arith.constant 1.00000012 : f32
    %cst_23 = arith.constant 5.000000e+00 : f32
    %83 = vector.broadcast %cst_22 : f32 to vector<1x128xf32>
    %84 = arith.maximumf %83, %82 : vector<1x128xf32>
    %85 = vector.broadcast %cst_23 : f32 to vector<1x128xf32>
    %86 = arith.minimumf %85, %84 : vector<1x128xf32>
    %cst_24 = arith.constant 1.000000e+00 : f32
    %87 = vector.broadcast %cst_24 : f32 to vector<1x128xf32>
    %88 = arith.subf %86, %87 : vector<1x128xf32>
    %cst_25 = arith.constant 1.000000e+00 : f32
    %89 = vector.broadcast %cst_25 : f32 to vector<1x128xf32>
    %90 = arith.addf %86, %89 : vector<1x128xf32>
    %91 = arith.mulf %88, %90 : vector<1x128xf32>
    %92 = math.sqrt %91 : vector<1x128xf32>
    %93 = arith.addf %86, %92 : vector<1x128xf32>
    %94 = math.log %93 : vector<1x128xf32>
    %95 = arith.mulf %71, %10 : vector<8x128xf32>
    %cst_26 = arith.constant dense<0.000000e+00> : vector<128xf32>
    %96 = vector.multi_reduction <add>, %95, %cst_26 [0] : vector<8x128xf32> to vector<128xf32>
    %97 = vector.shape_cast %96 : vector<128xf32> to vector<1x128xf32>
    %98 = arith.andi %60, %62 : vector<1x128xi1>
    %99 = arith.mulf %69, %34 : vector<1x128xf32>
    %100 = arith.subf %97, %99 : vector<1x128xf32>
    %101 = arith.select %98, %97, %100 : vector<1x128xi1>, vector<1x128xf32>
    %102 = vector.broadcast %101 : vector<1x128xf32> to vector<8x128xf32>
    %103 = arith.mulf %102, %71 : vector<8x128xf32>
    %104 = arith.addf %10, %103 : vector<8x128xf32>
    %105 = arith.mulf %104, %104 : vector<8x128xf32>
    %cst_27 = arith.constant dense<0.000000e+00> : vector<128xf32>
    %106 = vector.multi_reduction <add>, %105, %cst_27 [0] : vector<8x128xf32> to vector<128xf32>
    %107 = vector.shape_cast %106 : vector<128xf32> to vector<1x128xf32>
    %108 = math.sqrt %107 : vector<1x128xf32>
    %cst_28 = arith.constant 1.000000e-07 : f32
    %109 = vector.broadcast %cst_28 : f32 to vector<1x128xf32>
    %110 = arith.maximumf %108, %109 : vector<1x128xf32>
    %cst_29 = arith.constant 1.000000e+00 : f32
    %111 = vector.broadcast %cst_29 : f32 to vector<1x128xf32>
    %112 = arith.divf %111, %110 : vector<1x128xf32>
    %113 = vector.broadcast %112 : vector<1x128xf32> to vector<8x128xf32>
    %114 = arith.mulf %104, %113 : vector<8x128xf32>
    %115 = arith.mulf %71, %114 : vector<8x128xf32>
    %cst_30 = arith.constant dense<0.000000e+00> : vector<128xf32>
    %116 = vector.multi_reduction <add>, %115, %cst_30 [0] : vector<8x128xf32> to vector<128xf32>
    %117 = vector.shape_cast %116 : vector<128xf32> to vector<1x128xf32>
    %118 = arith.mulf %117, %73 : vector<1x128xf32>
    %119 = arith.mulf %114, %114 : vector<8x128xf32>
    %cst_31 = arith.constant dense<0.000000e+00> : vector<128xf32>
    %120 = vector.multi_reduction <add>, %119, %cst_31 [0] : vector<8x128xf32> to vector<128xf32>
    %121 = vector.shape_cast %120 : vector<128xf32> to vector<1x128xf32>
    %122 = arith.mulf %118, %118 : vector<1x128xf32>
    %123 = arith.cmpf ogt, %121, %122 : vector<1x128xf32>
    %124 = arith.subf %121, %122 : vector<1x128xf32>
    %125 = arith.select %123, %121, %124 : vector<1x128xi1>, vector<1x128xf32>
    %cst_32 = arith.constant 9.99999996E-13 : f32
    %126 = vector.broadcast %cst_32 : f32 to vector<1x128xf32>
    %127 = arith.maximumf %125, %126 : vector<1x128xf32>
    %128 = math.sqrt %127 : vector<1x128xf32>
    %cst_33 = arith.constant 1.000000e-07 : f32
    %129 = vector.broadcast %cst_33 : f32 to vector<1x128xf32>
    %130 = arith.maximumf %128, %129 : vector<1x128xf32>
    %131 = arith.divf %94, %130 : vector<1x128xf32>
    %cst_34 = arith.constant -5.000000e+00 : f32
    %cst_35 = arith.constant 5.000000e+00 : f32
    %132 = vector.broadcast %cst_34 : f32 to vector<1x128xf32>
    %133 = arith.maximumf %132, %131 : vector<1x128xf32>
    %134 = vector.broadcast %cst_35 : f32 to vector<1x128xf32>
    %135 = arith.minimumf %134, %133 : vector<1x128xf32>
    %136 = arith.mulf %135, %118 : vector<1x128xf32>
    %137 = vector.broadcast %135 : vector<1x128xf32> to vector<8x128xf32>
    %138 = arith.mulf %137, %114 : vector<8x128xf32>
    %139 = arith.mulf %71, %138 : vector<8x128xf32>
    %cst_36 = arith.constant dense<0.000000e+00> : vector<128xf32>
    %140 = vector.multi_reduction <add>, %139, %cst_36 [0] : vector<8x128xf32> to vector<128xf32>
    %141 = vector.shape_cast %140 : vector<128xf32> to vector<1x128xf32>
    %142 = arith.andi %60, %123 : vector<1x128xi1>
    %143 = arith.mulf %69, %136 : vector<1x128xf32>
    %144 = arith.subf %141, %143 : vector<1x128xf32>
    %145 = arith.select %142, %141, %144 : vector<1x128xi1>, vector<1x128xf32>
    %146 = vector.broadcast %145 : vector<1x128xf32> to vector<8x128xf32>
    %147 = arith.mulf %146, %71 : vector<8x128xf32>
    %148 = arith.addf %138, %147 : vector<8x128xf32>
    %149 = arith.mulf %148, %148 : vector<8x128xf32>
    %cst_37 = arith.constant dense<0.000000e+00> : vector<128xf32>
    %150 = vector.multi_reduction <add>, %149, %cst_37 [0] : vector<8x128xf32> to vector<128xf32>
    %151 = vector.shape_cast %150 : vector<128xf32> to vector<1x128xf32>
    %152 = math.sqrt %151 : vector<1x128xf32>
    %cst_38 = arith.constant 1.000000e-07 : f32
    %153 = vector.broadcast %cst_38 : f32 to vector<1x128xf32>
    %154 = arith.maximumf %152, %153 : vector<1x128xf32>
    %cst_39 = arith.constant 1.000000e+00 : f32
    %155 = vector.broadcast %cst_39 : f32 to vector<1x128xf32>
    %156 = arith.divf %155, %154 : vector<1x128xf32>
    %157 = vector.broadcast %156 : vector<1x128xf32> to vector<8x128xf32>
    %158 = arith.mulf %148, %157 : vector<8x128xf32>
    %159 = arith.mulf %71, %158 : vector<8x128xf32>
    %cst_40 = arith.constant dense<0.000000e+00> : vector<128xf32>
    %160 = vector.multi_reduction <add>, %159, %cst_40 [0] : vector<8x128xf32> to vector<128xf32>
    %161 = vector.shape_cast %160 : vector<128xf32> to vector<1x128xf32>
    %162 = arith.mulf %161, %73 : vector<1x128xf32>
    %163 = vector.shape_cast %162 : vector<1x128xf32> to vector<1x128xf32>
    %164 = vector.broadcast %163 : vector<1x128xf32> to vector<8x128xf32>
    %165 = arith.select %4, %158, %164 : vector<8x128xi1>, vector<8x128xf32>
    %c0_41 = arith.constant 0 : index
    %c0_42 = arith.constant 0 : index
    %166 = vector.load %arg3[%c0_41, %c0_42] : memref<8x128xf32, #tpu.memory_space<vmem>>, vector<8x128xf32>
    tpu.vector_store %arg3[%c0_41, %c0_42], %165 {strides = array<i32>} : memref<8x128xf32, #tpu.memory_space<vmem>>, vector<8x128xf32>,
    return
  }
  func.func @transform_0(%arg0: i32) -> (i32, i32) {
    %c0_i32 = arith.constant 0 : i32
    %c0_i32_0 = arith.constant 0 : i32
    return %c0_i32, %arg0 : i32, i32
  }
  func.func @transform_1(%arg0: i32) -> (i32, i32) {
    %c0_i32 = arith.constant 0 : i32
    %c0_i32_0 = arith.constant 0 : i32
    return %c0_i32, %arg0 : i32, i32
  }
  func.func @transform_2(%arg0: i32) -> (i32, i32) {
    %c0_i32 = arith.constant 0 : i32
    %c0_i32_0 = arith.constant 0 : i32
    return %c0_i32, %arg0 : i32, i32
  }
  func.func @transform_3(%arg0: i32) -> (i32, i32) {
    %c0_i32 = arith.constant 0 : i32
    %c0_i32_0 = arith.constant 0 : i32
    return %c0_i32, %arg0 : i32, i32
  }
}

</mosaic_0001>

<bundles_post_ra>
// kernel: tpu_custom_call.1
= control target key start
LH: loop header
LB: loop body
LE: loop exit
PB: predicated region body
PF: predicated region fallthrough
CT: control target
= control target key end

     0   :  { %9 = vsyncpa [#allocation3], 0  ;;  %s639_s0 = inlined_call_operand.hbm [shape: f32[8,128], index: 0, kind: input, shape index: {}]   ;;  %s640_s1 = inlined_call_operand.hbm [shape: f32[8,128], index: 1, kind: input, shape index: {}]   ;;  %s641_s2 = inlined_call_operand.hbm [shape: f32[8,128], index: 2, kind: output, shape index: {0}]   ;;  %s642_s3 = inlined_call_operand.hbm [shape: f32[1,128], index: 3, kind: output, shape index: {1}]  }
   0x1   :  { %10 = vsyncpa [#allocation6], 0 }
   0x2   :  { %11 = vsyncpa [#allocation4], 0 }
   0x3   :  { %12 = vsyncpa [#allocation9], 0  ;;  %s456_s12 = smov [#allocation2]   ;;  %s457_s14 = smov [#allocation5]  }
   0x4   :  { %s19_s13 = sshll.u32 %s456_s12, 4  ;;  %s29_s15 = sshll.u32 %s457_s14, 4  ;;  %s20_s13 = int_to_ptr.vmem [resolvable:$true] %s19_s13  ;;  %s30_s15 = int_to_ptr.vmem [resolvable:$true] %s29_s15 }
   0x5   :  { %s360_s18 = scalar_lea.hbm %s639_s0, 128 }
   0x6   :  { %p361_p0 = scmp.ne.s32.totalorder %s639_s0, %s360_s18  ;;  %p364_p1 = scmp.lt.u32.totalorder %s360_s18, %s639_s0 }
   0x8   :  { %p366_p2 = pnand %p364_p1, %p361_p0 }
   0xa   :  { %369 = shalt.err (!%p366_p2)
}
   0xb   :  { %s370_s23 = scalar_lea.vmem %s20_s13, 128  ;;  %p375_p4 = scmp.lt.s32.totalorder %s20_s13, %s20_s13 }
   0xc   :  { %p371_p3 = scmp.ne.s32.totalorder %s20_s13, %s370_s23  ;;  %p376_p5 = scmp.lt.s32.totalorder %s370_s23, %s370_s23 }
   0xe   :  { %p377_p6 = por %p376_p5, %p375_p4 }
  0x10   :  { %p378_p7 = pnand %p377_p6, %p371_p3 }
  0x12   :  { %381 = shalt.err (!%p378_p7)
}
  0x13   :  { %22 = dma.hbm_to_vmem [thread:$0]  %s639_s0, 128, %s20_s13, [#allocation3]  }
  0x14   :  { %s382_s28 = scalar_lea.hbm %s640_s1, 128 }
  0x15   :  { %p383_p8 = scmp.ne.s32.totalorder %s640_s1, %s382_s28  ;;  %p386_p9 = scmp.lt.u32.totalorder %s382_s28, %s640_s1 }
  0x17   :  { %p388_p10 = pnand %p386_p9, %p383_p8 }
  0x19   :  { %391 = shalt.err (!%p388_p10)
}
  0x1a   :  { %s392_s6 = scalar_lea.vmem %s30_s15, 128  ;;  %p397_p12 = scmp.lt.s32.totalorder %s30_s15, %s30_s15 }
  0x1b   :  { %p393_p11 = scmp.ne.s32.totalorder %s30_s15, %s392_s6  ;;  %p398_p13 = scmp.lt.s32.totalorder %s392_s6, %s392_s6 }
  0x1d   :  { %p399_p0 = por %p398_p13, %p397_p12 }
  0x1f   :  { %p400_p1 = pnand %p399_p0, %p393_p11 }
  0x21   :  { %403 = shalt.err (!%p400_p1)
}
  0x22   :  { %32 = dma.hbm_to_vmem [thread:$0]  %s640_s1, 128, %s30_s15, [#allocation6]  }
  0x23   :  { %448 = dma.done.wait [#allocation3], 128  }
  0x24   :  { %449 = vsyncadd [#allocation3], 4294967168 }
  0x25   :  { %450 = dma.done.wait [#allocation6], 128  }
  0x26   :  { %451 = vsyncadd [#allocation6], 4294967168  ;;  %v41_v0 = vlaneseq  ;;  %v507_v2 = vld [vmem:[#allocation2] sm:$0xff]  ;;  %v509_v3 = vld [vmem:[#allocation5] sm:$0xff]  ;;  %vm117_vm14 = vcmask 1040384   ;;  %s458_s1 = smov [#allocation8]  }
  0x27   :  { %v74_v38 = vand.u32 2147483647, %v507_v2  ;;  %v86_v43 = vand.u32 2147483647, %v509_v3  ;;  %s310_s8 = sshll.u32 %s458_s1, 4  ;;  %s311_s8 = int_to_ptr.vmem [resolvable:$true] %s310_s8 }
  0x28   :  { %v504_v1 = vshrl.u32 %v41_v0, 7  ;;  %s404_s9 = scalar_lea.vmem %s311_s8, 16  ;;  %s408_s10 = scalar_lea.vmem %s311_s8, 32 }
  0x29   :  { %p405_p2 = scmp.ne.s32.totalorder %s311_s8, %s404_s9  ;;  %p409_p3 = scmp.lt.s32.totalorder %s311_s8, %s311_s8 }
  0x2a   :  { %vm43_vm0 = vcmp.ne.s32.totalorder %v504_v1, 0  ;;  %p410_p4 = scmp.lt.s32.totalorder %s408_s10, %s404_s9 }
  0x2b   :  { %v514_v4 = vsel %vm43_vm0, %v507_v2, 0.0  ;;  %v519_v5 = vsel %vm43_vm0, %v509_v3, 0.0 }
  0x2c   :  { %v46_v6 = vmul.f32 %v514_v4, %v514_v4  ;;  %v53_v7 = vmul.f32 %v519_v5, %v519_v5  ;;  %v100_v8 = vand.u32 2147483647, %v519_v5  ;;  %v98_v11 = vsub.f32 %v514_v4, %v519_v5  ;;  %p411_p5 = por %p410_p4, %p409_p3 }
  0x2d   :  { %v146_v17 = vmul.f32 %v519_v5, %v514_v4 }
  0x2e   :  { %v47_v9 = vrot.slane %v46_v6, 4  ;;  %v54_v10 = vrot.slane %v53_v7, 4  ;;  %v101_v12 = vmul.f32 1e-05, %v100_v8  ;;  %v99_v18 = vand.u32 2147483647, %v98_v11  ;;  %p412_p6 = pnand %p411_p5, %p405_p2 }
  0x2f   :  { %v147_v24 = vrot.slane %v146_v17, 4 }
  0x30   :  { %v48_v13 = vadd.f32 %v47_v9, %v46_v6  ;;  %v55_v14 = vadd.f32 %v54_v10, %v53_v7  ;;  %v102_v19 = vadd.f32 1e-07, %v101_v12 }
  0x31   :  { %v148_v28 = vadd.f32 %v147_v24, %v146_v17 }
  0x32   :  { %v49_v15 = vrot.slane %v48_v13, 2  ;;  %v56_v16 = vrot.slane %v55_v14, 2  ;;  %v103_v25 = vsub.f32 %v99_v18, %v102_v19 }
  0x33   :  { %v149_v32 = vrot.slane %v148_v28, 2 }
  0x34   :  { %v50_v20 = vadd.f32 %v49_v15, %v48_v13  ;;  %v57_v21 = vadd.f32 %v56_v16, %v55_v14  ;;  %v104_v29 = vrot.slane %v103_v25, 4 }
  0x35   :  { %v150_v34 = vadd.f32 %v149_v32, %v148_v28 }
  0x36   :  { %v51_v22 = vrot.slane %v50_v20, 1  ;;  %v58_v23 = vrot.slane %v57_v21, 1  ;;  %v105_v33 = vmax.f32 %v103_v25, %v104_v29  ;;  %v573_v29 = vsub.s32 0, %v504_v1 }
  0x37   :  { %v151_v44 = vrot.slane %v150_v34, 1 }
  0x38   :  { %v530_v26 = vadd.f32 %v51_v22, %v50_v20  ;;  %v532_v27 = vadd.f32 %v58_v23, %v57_v21  ;;  %v106_v35 = vrot.slane %v105_v33, 2 }
  0x39   :  { %v152_v63 = vadd.f32 %v151_v44, %v150_v34 }
  0x3a   :  { %330 = vrsqrt.f32 %v530_v26  ;;  %v77_v30 = vadd.f32 1.0, %v530_v26  ;;  %v89_v31 = vadd.f32 1.0, %v532_v27  ;;  %vm62_vm1 = vcmp.eq.f32.partialorder %v530_v26, inf }
  0x3b   :  { %332 = vrsqrt.f32 %v532_v27  ;;  %v65_v37 = vand.u32 2147483648, %v530_v26  ;;  %vm64_vm2 = vcmp.eq.f32.partialorder %v530_v26, 0.0  ;;  %vm69_vm3 = vcmp.eq.f32.partialorder %v532_v27, inf }
  0x3c   :  { %334 = vrsqrt.f32 %v77_v30  ;;  %v72_v41 = vand.u32 2147483648, %v532_v27  ;;  %vm71_vm4 = vcmp.eq.f32.partialorder %v532_v27, 0.0  ;;  %vm80_vm5 = vcmp.eq.f32.partialorder %v77_v30, inf }
  0x3d   :  { %336 = vrsqrt.f32 %v89_v31  ;;  %vm82_vm6 = vcmp.eq.f32.partialorder %v77_v30, 0.0  ;;  %v107_v46 = vmax.f32 %v105_v33, %v106_v35  ;;  %v83_v50 = vand.u32 2147483648, %v77_v30 }
  0x3e   :  { %vm92_vm7 = vcmp.eq.f32.partialorder %v89_v31, inf  ;;  %v95_v55 = vand.u32 2147483648, %v89_v31  ;;  %vm94_vm9 = vcmp.eq.f32.partialorder %v89_v31, 0.0 }
  0x3f   :  { %v108_v2 = vrot.slane %v107_v46, 1 }
  0x41   :  { %v109_v16 = vmax.f32 %v107_v46, %v108_v2 }
  0x44   :  { %v331_v36 = vpop.eup %330 }
  0x45   :  { %v333_v39 = vpop.eup %332  ;;  %v61_v40 = vmul.f32 %v331_v36, %v530_v26 }
  0x46   :  { %v68_v42 = vmul.f32 %v333_v39, %v532_v27  ;;  %v335_v47 = vpop.eup %334 }
  0x47   :  { %v63_v45 = vsel %vm62_vm1, %v530_v26, %v61_v40  ;;  %v337_v51 = vpop.eup %336  ;;  %v79_v54 = vmul.f32 %v335_v47, %v77_v30 }
  0x48   :  { %v66_v48 = vsel %vm64_vm2, %v65_v37, %v63_v45  ;;  %v70_v49 = vsel %vm69_vm3, %v532_v27, %v68_v42  ;;  %v91_v57 = vmul.f32 %v337_v51, %v89_v31 }
  0x49   :  { %v73_v52 = vsel %vm71_vm4, %v72_v41, %v70_v49  ;;  %v76_v53 = vmul.f32 0.9, %v66_v48  ;;  %vm75_vm8 = vcmp.gt.f32.partialorder %v66_v48, %v74_v38  ;;  %v81_v58 = vsel %vm80_vm5, %v77_v30, %v79_v54 }
  0x4a   :  { %v88_v56 = vmul.f32 0.9, %v73_v52  ;;  %vm87_vm10 = vcmp.gt.f32.partialorder %v73_v52, %v86_v43  ;;  %v84_v59 = vsel %vm82_vm6, %v83_v50, %v81_v58  ;;  %v93_v60 = vsel %vm92_vm7, %v89_v31, %v91_v57 }
  0x4b   :  { %v85_v61 = vsel %vm75_vm8, %v76_v53, %v84_v59  ;;  %v96_v62 = vsel %vm94_vm9, %v95_v55, %v93_v60 }
  0x4c   :  { %v97_v0 = vsel %vm87_vm10, %v88_v56, %v96_v62  ;;  %v552_v3 = vmul.f32 %v85_v61, %v85_v61 }
  0x4d   :  { %v110_v6 = vsub.f32 %v85_v61, %v97_v0  ;;  %v112_v7 = vand.u32 2147483647, %v97_v0  ;;  %v124_v8 = vmul.f32 %v97_v0, %v97_v0  ;;  %v154_v9 = vmul.f32 %v97_v0, %v85_v61 }
  0x4e   :  { %vm123_vm11 = vcmp.gt.f32.partialorder %v530_v26, %v552_v3  ;;  %v126_v10 = vsub.f32 %v530_v26, %v552_v3 }
  0x4f   :  { %v111_v11 = vand.u32 2147483647, %v110_v6  ;;  %v113_v12 = vmul.f32 1e-05, %v112_v7  ;;  %vm125_vm12 = vcmp.gt.f32.partialorder %v532_v27, %v124_v8  ;;  %v155_v13 = vsub.f32 %v152_v63, %v154_v9 }
  0x50   :  { %v127_v14 = vsel %vm123_vm11, %v530_v26, %v126_v10  ;;  %vm566_vm13 = vmand %vm123_vm11, %vm125_vm12 }
  0x51   :  { %v114_v17 = vadd.f32 1e-07, %v113_v12  ;;  %v128_v18 = vand.u32 2147483647, %v127_v14  ;;  %v156_v19 = vsel %vm566_vm13, %v152_v63, %v155_v13 }
  0x52   :  { %v157_v59 = vsub.f32 0.0, %v156_v19 }
  0x53   :  { %v115_v20 = vsub.f32 %v111_v11, %v114_v17  ;;  %338 = vrsqrt.f32 %v128_v18  ;;  %vm131_vm15 = vcmp.eq.f32.partialorder %v128_v18, inf  ;;  %v134_v24 = vand.u32 2147483648, %v128_v18 }
  0x54   :  { %vm133_vm1 = vcmp.eq.f32.partialorder %v128_v18, 0.0  ;;  %v158_v60 = vmax.f32 %v157_v59, 1.0000001 }
  0x55   :  { %v116_v21 = vmax.f32 %v109_v16, %v115_v20 }
  0x57   :  { %v118_v22 = vsel %vm117_vm14, %v116_v21, -inf }
  0x58   :  { %119 = vmax.xlane.f32.xlu0 %v118_v22 }
  0x5d   :  { %v339_v23 = vpop.eup %338 }
  0x5e   :  { %v130_v25 = vmul.f32 %v339_v23, %v128_v18 }
  0x60   :  { %v132_v27 = vsel %vm131_vm15, %v128_v18, %v130_v25 }
  0x61   :  { %v135_v28 = vsel %vm133_vm1, %v134_v24, %v132_v27 }
  0x62   :  { %340 = vrcp.f32 %v135_v28 }
  0x6c   :  { %v341_v30 = vpop.eup %340 }
  0x6d   :  { %v142_v31 = vrot.slane %v341_v30, %v573_v29  ;;  %v581_v36 = vmul.f32 %v341_v30, %v85_v61 }
  0x6f   :  { %v577_v32 = vmul.f32 %v142_v31, %v514_v4  ;;  %v180_v39 = vmul.f32 %v581_v36, %v97_v0 }
  0x71   :  { %v173_v33 = vmul.f32 %v577_v32, %v519_v5 }
  0x73   :  { %v174_v34 = vrot.slane %v173_v33, 4 }
  0x75   :  { %v175_v35 = vadd.f32 %v174_v34, %v173_v33 }
  0x77   :  { %v176_v37 = vrot.slane %v175_v35, 2 }
  0x79   :  { %v177_v38 = vadd.f32 %v176_v37, %v175_v35 }
  0x7b   :  { %v178_v40 = vrot.slane %v177_v38, 1 }
  0x7d   :  { %v179_v41 = vadd.f32 %v178_v40, %v177_v38 }
  0x7f   :  { %v181_v42 = vsub.f32 %v179_v41, %v180_v39 }
  0x81   :  { %v182_v43 = vsel %vm566_vm13, %v179_v41, %v181_v42 }
  0x82   :  { %v186_v4 = vrot.slane %v182_v43, %v573_v29 }
  0x84   :  { %v187_v44 = vmul.f32 %v186_v4, %v577_v32 }
  0x86   :  { %v188_v45 = vadd.f32 %v187_v44, %v519_v5  ;;  %v159_v5 = vmin.f32 %v158_v60, 5.0 }
  0x88   :  { %v189_v46 = vmul.f32 %v188_v45, %v188_v45  ;;  %v324_v63 = vadd.f32 -1.0, %v159_v5  ;;  %v161_v0 = vadd.f32 1.0, %v159_v5 }
  0x8a   :  { %v190_v47 = vrot.slane %v189_v46, 4  ;;  %v162_v9 = vmul.f32 %v324_v63, %v161_v0 }
  0x8c   :  { %v191_v48 = vadd.f32 %v190_v47, %v189_v46  ;;  %vm165_vm5 = vcmp.eq.f32.partialorder %v162_v9, inf  ;;  %v168_v30 = vand.u32 2147483648, %v162_v9  ;;  %vm167_vm6 = vcmp.eq.f32.partialorder %v162_v9, 0.0 }
  0x8e   :  { %v192_v49 = vrot.slane %v191_v48, 2 }
  0x90   :  { %v193_v50 = vadd.f32 %v192_v49, %v191_v48 }
  0x92   :  { %v194_v51 = vrot.slane %v193_v50, 1 }
  0x94   :  { %v195_v52 = vadd.f32 %v194_v51, %v193_v50 }
  0x96   :  { %342 = vrsqrt.f32 %v195_v52  ;;  %vm198_vm2 = vcmp.eq.f32.partialorder %v195_v52, inf  ;;  %v201_v54 = vand.u32 2147483648, %v195_v52  ;;  %vm200_vm3 = vcmp.eq.f32.partialorder %v195_v52, 0.0 }
  0xa0   :  { %v343_v53 = vpop.eup %342 }
  0xa1   :  { %v197_v55 = vmul.f32 %v343_v53, %v195_v52 }
  0xa3   :  { %v199_v56 = vsel %vm198_vm2, %v195_v52, %v197_v55 }
  0xa4   :  { %v202_v57 = vsel %vm200_vm3, %v201_v54, %v199_v56 }
  0xa5   :  { %v203_v58 = vmax.f32 %v202_v57, 1e-07 }
  0xa7   :  { %344 = vrcp.f32 %v203_v58 }
  0xa8   :  { %346 = vrcp.f32 %v581_v36 }
  0xa9   :  { %348 = vrsqrt.f32 %v162_v9 }
  0xb1   :  { %v345_v61 = vpop.eup %344 }
  0xb2   :  { %v589_v62 = vmul.f32 %v345_v61, %v188_v45  ;;  %v596_v18 = vpop.eup %346 }
  0xb3   :  { %v349_v23 = vpop.eup %348 }
  0xb4   :  { %v207_v2 = vmul.f32 %v589_v62, %v577_v32  ;;  %v215_v6 = vmul.f32 %v589_v62, %v589_v62  ;;  %v164_v25 = vmul.f32 %v349_v23, %v162_v9 }
  0xb6   :  { %v208_v7 = vrot.slane %v207_v2, 4  ;;  %v216_v8 = vrot.slane %v215_v6, 4  ;;  %v166_v31 = vsel %vm165_vm5, %v162_v9, %v164_v25 }
  0xb7   :  { %v169_v33 = vsel %vm167_vm6, %v168_v30, %v166_v31 }
  0xb8   :  { %v209_v10 = vadd.f32 %v208_v7, %v207_v2  ;;  %v217_v11 = vadd.f32 %v216_v8, %v215_v6  ;;  %v170_v34 = vadd.f32 %v169_v33, %v159_v5 }
  0xba   :  { %v210_v12 = vrot.slane %v209_v10, 2  ;;  %v218_v13 = vrot.slane %v217_v11, 2 }
  0xbc   :  { %v211_v14 = vadd.f32 %v210_v12, %v209_v10  ;;  %v219_v15 = vadd.f32 %v218_v13, %v217_v11 }
  0xbe   :  { %v212_v16 = vrot.slane %v211_v14, 1  ;;  %v220_v17 = vrot.slane %v219_v15, 1 }
  0xc0   :  { %v213_v19 = vadd.f32 %v212_v16, %v211_v14  ;;  %v221_v21 = vadd.f32 %v220_v17, %v219_v15 }
  0xc2   :  { %v214_v20 = vmul.f32 %v596_v18, %v213_v19 }
  0xc4   :  { %v222_v22 = vmul.f32 %v214_v20, %v214_v20 }
  0xc6   :  { %vm223_vm4 = vcmp.gt.f32.partialorder %v221_v21, %v222_v22  ;;  %v224_v24 = vsub.f32 %v221_v21, %v222_v22 }
  0xc8   :  { %v225_v27 = vsel %vm223_vm4, %v221_v21, %v224_v24 }
  0xc9   :  { %v226_v28 = vmax.f32 %v225_v27, 1e-12 }
  0xcb   :  { %350 = vrsqrt.f32 %v226_v28  ;;  %vm229_vm7 = vcmp.eq.f32.partialorder %v226_v28, inf  ;;  %v232_v37 = vand.u32 2147483648, %v226_v28  ;;  %vm231_vm8 = vcmp.eq.f32.partialorder %v226_v28, 0.0 }
  0xcc   :  { %352 = vlog2.f32 %v170_v34 }
  0xd5   :  { %v351_v35 = vpop.eup %350 }
  0xd6   :  { %v228_v38 = vmul.f32 %v351_v35, %v226_v28  ;;  %v353_v42 = vpop.eup %352 }
  0xd7   :  { %v172_v43 = vmul.f32 0.6931472, %v353_v42 }
  0xd8   :  { %v230_v39 = vsel %vm229_vm7, %v226_v28, %v228_v38 }
  0xd9   :  { %v233_v40 = vsel %vm231_vm8, %v232_v37, %v230_v39 }
  0xda   :  { %v234_v41 = vmax.f32 %v233_v40, 1e-07 }
  0xdc   :  { %354 = vrcp.f32 %v234_v41 }
  0xe5   :  { %v120_v4 = vpop.xlane.xlu0 %119 }
  0xe6   :  { %v355_v44 = vpop.eup %354  ;;  %121 = vst [vmem:[#allocation8] sm:$0x1] %v120_v4 }
  0xe7   :  { %v236_v45 = vmul.f32 %v355_v44, %v172_v43 }
  0xe8   :  { %415 = shalt.err (!%p412_p6)
}
  0xe9   :  { %s416_s13 = scalar_lea.hbm %s642_s3, 16 }
  0xea   :  { %p417_p7 = scmp.ne.s32.totalorder %s642_s3, %s416_s13  ;;  %p420_p8 = scmp.lt.u32.totalorder %s416_s13, %s642_s3 }
  0xec   :  { %p422_p9 = pnand %p420_p8, %p417_p7 }
  0xee   :  { %425 = shalt.err (!%p422_p9)
}
  0xef   :  { %313 = dma.vmem_to_hbm [thread:$0]  %s311_s8, 16, %s642_s3, [#allocation9]   ;;  %v325_v46 = vclamps-f32 %v236_v45, 5.0  ;;  %vm252_vm9 = vmand %vm123_vm11, %vm223_vm4 }
  0xf0   :  { %s459_s3 = smov [#allocation7]  }
  0xf1   :  { %v239_v47 = vmul.f32 %v325_v46, %v214_v20  ;;  %v243_v48 = vrot.slane %v325_v46, %v573_v29  ;;  %s300_s20 = sshll.u32 %s459_s3, 4  ;;  %s301_s20 = int_to_ptr.vmem [resolvable:$true] %s300_s20 }
  0xf2   :  { %s426_s21 = scalar_lea.vmem %s301_s20, 128  ;;  %p431_p11 = scmp.lt.s32.totalorder %s301_s20, %s301_s20 }
  0xf3   :  { %v244_v49 = vmul.f32 %v243_v48, %v589_v62  ;;  %v253_v56 = vmul.f32 %v239_v47, %v581_v36  ;;  %p427_p10 = scmp.ne.s32.totalorder %s301_s20, %s426_s21  ;;  %p432_p12 = scmp.lt.s32.totalorder %s426_s21, %s426_s21 }
  0xf5   :  { %v245_v50 = vmul.f32 %v244_v49, %v577_v32  ;;  %p433_p13 = por %p432_p12, %p431_p11 }
  0xf7   :  { %v246_v51 = vrot.slane %v245_v50, 4  ;;  %p434_p0 = pnand %p433_p13, %p427_p10 }
  0xf9   :  { %v247_v52 = vadd.f32 %v246_v51, %v245_v50 }
  0xfb   :  { %v248_v53 = vrot.slane %v247_v52, 2 }
  0xfd   :  { %v249_v54 = vadd.f32 %v248_v53, %v247_v52 }
  0xff   :  { %v250_v55 = vrot.slane %v249_v54, 1 }
 0x101   :  { %v251_v57 = vadd.f32 %v250_v55, %v249_v54 }
 0x103   :  { %v254_v58 = vsub.f32 %v251_v57, %v253_v56 }
 0x105   :  { %v255_v59 = vsel %vm252_vm9, %v251_v57, %v254_v58 }
 0x106   :  { %v259_v60 = vrot.slane %v255_v59, %v573_v29 }
 0x108   :  { %v260_v5 = vmul.f32 %v259_v60, %v577_v32 }
 0x10a   :  { %v261_v61 = vadd.f32 %v260_v5, %v244_v49 }
 0x10c   :  { %v262_v62 = vmul.f32 %v261_v61, %v261_v61 }
 0x10e   :  { %v263_v63 = vrot.slane %v262_v62, 4 }
 0x110   :  { %v264_v0 = vadd.f32 %v263_v63, %v262_v62 }
 0x112   :  { %v265_v2 = vrot.slane %v264_v0, 2 }
 0x114   :  { %v266_v6 = vadd.f32 %v265_v2, %v264_v0 }
 0x116   :  { %v267_v7 = vrot.slane %v266_v6, 1 }
 0x118   :  { %v268_v36 = vadd.f32 %v267_v7, %v266_v6 }
 0x11a   :  { %356 = vrsqrt.f32 %v268_v36  ;;  %vm271_vm10 = vcmp.eq.f32.partialorder %v268_v36, inf  ;;  %v274_v9 = vand.u32 2147483648, %v268_v36  ;;  %vm273_vm11 = vcmp.eq.f32.partialorder %v268_v36, 0.0 }
 0x124   :  { %v357_v8 = vpop.eup %356 }
 0x125   :  { %v270_v26 = vmul.f32 %v357_v8, %v268_v36 }
 0x127   :  { %v272_v3 = vsel %vm271_vm10, %v268_v36, %v270_v26 }
 0x128   :  { %v275_v10 = vsel %vm273_vm11, %v274_v9, %v272_v3 }
 0x129   :  { %v276_v11 = vmax.f32 %v275_v10, 1e-07 }
 0x12b   :  { %358 = vrcp.f32 %v276_v11 }
 0x135   :  { %v359_v12 = vpop.eup %358 }
 0x136   :  { %v279_v13 = vmul.f32 %v359_v12, %v261_v61 }
 0x138   :  { %v280_v14 = vmul.f32 %v279_v13, %v577_v32 }
 0x13a   :  { %v281_v15 = vrot.slane %v280_v14, 4 }
 0x13c   :  { %v282_v16 = vadd.f32 %v281_v15, %v280_v14 }
 0x13e   :  { %v283_v17 = vrot.slane %v282_v16, 2 }
 0x140   :  { %v284_v19 = vadd.f32 %v283_v17, %v282_v16 }
 0x142   :  { %v285_v20 = vrot.slane %v284_v19, 1 }
 0x144   :  { %v286_v21 = vadd.f32 %v285_v20, %v284_v19 }
 0x146   :  { %v287_v22 = vmul.f32 %v596_v18, %v286_v21 }
 0x148   :  { %v291_v23 = vrot.slane %v287_v22, %v573_v29 }
 0x14a   :  { %v292_v24 = vsel %vm43_vm0, %v279_v13, %v291_v23 }
 0x14b   :  { %293 = vst [vmem:[#allocation7] sm:$0xff] %v292_v24 }
 0x14c   :  { %437 = shalt.err (!%p434_p0)
}
 0x14d   :  { %s438_s24 = scalar_lea.hbm %s641_s2, 128 }
 0x14e   :  { %p439_p1 = scmp.ne.s32.totalorder %s641_s2, %s438_s24  ;;  %p442_p2 = scmp.lt.u32.totalorder %s438_s24, %s641_s2 }
 0x150   :  { %p444_p3 = pnand %p442_p2, %p439_p1 }
 0x152   :  { %447 = shalt.err (!%p444_p3)
}
 0x153   :  { %303 = dma.vmem_to_hbm [thread:$0]  %s301_s20, 128, %s641_s2, [#allocation4]  }
 0x154   :  { %452 = dma.done.wait [#allocation4], 128  }
 0x155   :  { %453 = vsyncadd [#allocation4], 4294967168 }
 0x156   :  { %454 = dma.done.wait [#allocation9], 16  }
 0x157   :  { %455 = vsyncadd [#allocation9], 4294967280 }
 0x158   :  { %320 = vsyncpa [#allocation3], 1 }
 0x159   :  { %321 = vsyncpa [#allocation6], 1 }
 0x15a   :  { %322 = vsyncpa [#allocation4], 1 }
 0x15b   :  { %323 = vsyncpa [#allocation9], 1 }

</bundles_post_ra>
